<compile_context>
chip_gen: v7x
topology: tpu7x:2x2x1
jax: 0.10.0
libtpu: 0.0.40
codegen_flags: <defaults>
</compile_context>

<pallas_src>
import functools

import jax
import jax.numpy as jnp
from jax.experimental import pallas as pl
from jax.experimental.pallas import tpu as pltpu


def _cdiv(a: int, b: int) -> int:
    return -(-a // b)


def _tpu_hints():
    """Best-effort (num_tensorcores, usable_vmem_bytes) for the local TPU generation."""
    cores = 1
    vmem_cap = 48 * 2**20                      # conservative fallback, safe on all chips
    try:
        info = pltpu.get_tpu_info()
        vc = getattr(info, "vmem_capacity_bytes", None)
        if vc:
            vmem_cap = int(0.80 * int(vc))     # leave headroom for Mosaic internals
    except Exception:
        pass
    try:
        kind = jax.devices()[0].device_kind.lower()
        if "v7" in kind or "tpu7" in kind:     # 2 TensorCores per chip on v7x
            cores = 2
    except Exception:
        pass
    return cores, vmem_cap


def _ls_ce_kernel(tgt_ref, lp_ref, out_ref, acc_ref, *,
                  smoothing: float, ignore_index: int, vocab: int,
                  n_rows: int, row_tile: int, tiles_per_partial: int):
    p = pl.program_id(0)          # "parallel" axis -> per-core partial sums
    j = pl.program_id(1)          # "arbitrary" axis -> sequential reduction over tiles

    @pl.when(j == 0)
    def _():
        acc_ref[...] = jnp.zeros_like(acc_ref)

    g = row_tile // 8
    eps_i = smoothing / (vocab - 1)

    # Cast in-vreg, then regroup rows into (g, 8, V) 8-row slabs.  The split keeps the
    # (8, 128) tiling of the last two dims, so it is a layout no-op after the f32 cast.
    lp = lp_ref[...].astype(jnp.float32).reshape(g, 8, vocab)     # (g, 8, V) f32
    tgt = tgt_ref[...].reshape(g, 8, 1)                           # (g, 8, 1) int32

    # Row-validity mask.  Uses the UNCLAMPED tile origin so fully out-of-range (clamped)
    # tiles contribute exactly zero; padded/garbage tail rows are also masked out.
    row_start = (p * tiles_per_partial + j) * row_tile
    grp = jax.lax.broadcasted_iota(jnp.int32, (g, 8, 1), 0)
    sub = jax.lax.broadcasted_iota(jnp.int32, (g, 8, 1), 1)
    row_id = row_start + grp * 8 + sub
    valid = jnp.logical_and(tgt != ignore_index, row_id < n_rows)  # (g, 8, 1)

    # Tiny loop-invariant column iota (8, V) instead of (row_tile, V); broadcast over
    # the row-group axis in the compare.
    col = jax.lax.broadcasted_iota(jnp.int32, (8, vocab), 1)
    onehot = col == tgt                                            # (g, 8, V)

    # Sign folded into the weight: -(1-s) on the target column, -eps_i elsewhere.
    w = jnp.where(onehot, jnp.float32(smoothing - 1.0), jnp.float32(-eps_i))

    # NaN-safe row masking: select on the product (padded edge blocks may hold garbage).
    contrib = jnp.where(valid, lp * w, 0.0)                        # (g, 8, V) f32

    # Reduce each tile to an (8, V) slab before accumulating: same number of VPU adds,
    # but the persistent accumulator is tiny (VMEM + vst friendly).
    acc_ref[...] += jnp.sum(contrib, axis=0)

    @pl.when(j == pl.num_programs(1) - 1)
    def _():
        partial = jnp.sum(acc_ref[...])            # small XLU reduce, once per partial
        out_ref[...] = jnp.broadcast_to(partial, out_ref.shape)


def label_smoothing_ce_loss(x, target, *, smoothing=0.1, ignore_index=0,
                            target_block_bytes=12 * 1024 * 1024,
                            num_partials=None):
    """x: [B, T, V] (or [N, V]) log-probabilities (any float dtype);
    target: [B, T] (or [N]) integer class indices.  Returns the scalar loss of
    LabelSmoothingCELoss(reduce=True)."""
    v = int(x.shape[-1])
    lp = x.reshape(-1, v)                            # native dtype, no wrapper cast pass
    tgt = target.reshape(-1, 1).astype(jnp.int32)
    n = int(lp.shape[0])

    cores, vmem_cap = _tpu_hints()
    if num_partials is None:
        num_partials = cores

    itemsize = jnp.dtype(lp.dtype).itemsize
    row_align = max(8, 32 // itemsize)               # f32: 8, bf16: 16, int8/fp8: 32

    # Clamp the streaming block so 2x double-buffered input blocks (+ slack) fit
    # under the per-generation VMEM cap, then derive the row tile.
    block_bytes = min(int(target_block_bytes),
                      max(1 << 20, (vmem_cap - (4 << 20)) // 2))
    rows = block_bytes // max(1, v * itemsize)
    rows = min(rows, n)
    rows = (rows // row_align) * row_align
    row_tile = max(row_align, rows)

    # pad only in the tiny-N corner case (N < one aligned tile)
    if n < row_tile:
        pad = row_tile - n
        lp = jnp.pad(lp, ((0, pad), (0, 0)))
        tgt = jnp.pad(tgt, ((0, pad), (0, 0)), constant_values=ignore_index)

    n_blocks = _cdiv(max(n, row_tile), row_tile)
    num_partials = max(1, min(int(num_partials), n_blocks))
    tiles_per_partial = _cdiv(n_blocks, num_partials)
    last_block = n_blocks - 1

    def block_idx(p_, j_):
        # Clamp so out-of-range tiles (ragged split across partials) still DMA
        # in-bounds data; their rows are zeroed by the in-kernel validity mask.
        return jnp.minimum(p_ * tiles_per_partial + j_, last_block)

    kernel = functools.partial(
        _ls_ce_kernel,
        smoothing=float(smoothing),
        ignore_index=int(ignore_index),
        vocab=v,
        n_rows=n,
        row_tile=int(row_tile),
        tiles_per_partial=int(tiles_per_partial),
    )

    vmem_need = (2 * row_tile * v * itemsize        # double-buffered log-prob blocks
                 + 2 * row_tile * 4                  # double-buffered target blocks
                 + 8 * v * 4                         # (8, V) f32 accumulator scratch
                 + (2 << 20))                        # slack (output blocks, metadata)
    vmem_limit = int(min(vmem_cap, max(32 << 20, vmem_need)))

    partials = pl.pallas_call(
        kernel,
        out_shape=jax.ShapeDtypeStruct((num_partials, 8, 128), jnp.float32),
        grid_spec=pltpu.PrefetchScalarGridSpec(
            num_scalar_prefetch=0,
            grid=(num_partials, tiles_per_partial),
            in_specs=[
                pl.BlockSpec((row_tile, 1), lambda p_, j_: (block_idx(p_, j_), 0)),
                pl.BlockSpec((row_tile, v), lambda p_, j_: (block_idx(p_, j_), 0)),
            ],
            out_specs=pl.BlockSpec((1, 8, 128), lambda p_, j_: (p_, 0, 0)),
            scratch_shapes=[pltpu.VMEM((8, v), jnp.float32)],
        ),
        compiler_params=pltpu.CompilerParams(
            dimension_semantics=("parallel", "arbitrary"),
            vmem_limit_bytes=vmem_limit),
    )(tgt, lp)

    # sum the per-core partial losses (loss.mean() of a 0-d tensor is the identity)
    return jnp.sum(partials[:, 0, 0])


def _reference(x, target, *, smoothing=0.1, ignore_index=0):
    v = x.shape[-1]
    lp = x.reshape(-1, v).astype(jnp.float32)
    tgt = target.reshape(-1).astype(jnp.int32)
    nll = -jnp.take_along_axis(lp, tgt[:, None], axis=-1)[:, 0]
    smooth = -jnp.sum(lp, axis=-1)
    mask = tgt == ignore_index
    nll = jnp.where(mask, 0.0, nll)
    smooth = jnp.where(mask, 0.0, smooth)
    nll_s = jnp.sum(nll)
    smooth_s = jnp.sum(smooth)
    eps_i = smoothing / (v - 1)
    return (1.0 - smoothing - eps_i) * nll_s + eps_i * smooth_s


if __name__ == "__main__":
    key = jax.random.PRNGKey(0)
    B, T, V = 2, 8, 32                      # batch=2, seq=8, vocab=32
    k1, k2 = jax.random.split(key)

    logits = jax.random.normal(k1, (B, T, V), dtype=jnp.float32)
    logprobs = jax.nn.log_softmax(logits, axis=-1)
    target = jax.random.randint(k2, (B, T), minval=0, maxval=V, dtype=jnp.int32)
    # force a few ignore_index (=0) positions to exercise the pad mask
    target = target.at[0, 0].set(0).at[1, 3].set(0)

    # f32 log-probabilities
    loss = label_smoothing_ce_loss(logprobs, target, smoothing=0.1, ignore_index=0)
    loss = jax.block_until_ready(loss)
    ref = _reference(logprobs, target, smoothing=0.1, ignore_index=0)
    assert jnp.allclose(loss, ref, rtol=1e-5, atol=1e-5), (loss, ref)

    # bf16 log-probabilities (native-dtype streaming, cast inside the kernel)
    lp_bf16 = logprobs.astype(jnp.bfloat16)
    loss_bf = jax.block_until_ready(
        label_smoothing_ce_loss(lp_bf16, target, smoothing=0.1, ignore_index=0))
    ref_bf = _reference(lp_bf16.astype(jnp.float32), target,
                        smoothing=0.1, ignore_index=0)
    assert jnp.allclose(loss_bf, ref_bf, rtol=1e-3, atol=1e-3), (loss_bf, ref_bf)

    print("KERNEL_OK")
</pallas_src>

<mosaic_0001>
module attributes {stable_mosaic.version = 11 : i64} {
  func.func @_ls_ce_kernel(%arg0: i32, %arg1: i32, %arg2: memref<16x1xi32, #tpu.memory_space<vmem>>, %arg3: memref<16x32xf32, #tpu.memory_space<vmem>>, %arg4: memref<1x8x128xf32, #tpu.memory_space<vmem>>, %arg5: memref<8x32xf32, #tpu.memory_space<vmem>>) attributes {dimension_semantics = [#tpu.dimension_semantics<parallel>, #tpu.dimension_semantics<arbitrary>], iteration_bounds = array<i64: 1, 1>, scalar_prefetch = 0 : i64, scratch_operands = 1 : i64, tpu.core_type = #tpu.core_type<tc>, window_params = [{transform_indices = @transform_0, window_bounds = array<i64: 16, 1>}, {transform_indices = @transform_1, window_bounds = array<i64: 16, 32>}, {transform_indices = @transform_2, window_bounds = array<i64: 1, 8, 128>}]} {
    %c0_i32 = arith.constant 0 : i32
    %0 = arith.cmpi eq, %arg1, %c0_i32 : i32
    %1 = arith.extui %0 : i1 to i32
    %c0_i32_0 = arith.constant 0 : i32
    %2 = arith.cmpi ne, %1, %c0_i32_0 : i32
    scf.if %2 {
      %cst_15 = arith.constant 0.000000e+00 : f32
      %42 = vector.broadcast %cst_15 : f32 to vector<8x32xf32>
      %c0_16 = arith.constant 0 : index
      %c0_17 = arith.constant 0 : index
      %43 = vector.load %arg5[%c0_16, %c0_17] : memref<8x32xf32, #tpu.memory_space<vmem>>, vector<8x32xf32>
      tpu.vector_store %arg5[%c0_16, %c0_17], %42 {strides = array<i32>} : memref<8x32xf32, #tpu.memory_space<vmem>>, vector<8x32xf32>,
    } else {
    }
    %c0 = arith.constant 0 : index
    %c0_1 = arith.constant 0 : index
    %3 = vector.load %arg3[%c0, %c0_1] : memref<16x32xf32, #tpu.memory_space<vmem>>, vector<16x32xf32>
    %4 = vector.shape_cast %3 : vector<16x32xf32> to vector<2x8x32xf32>
    %c0_2 = arith.constant 0 : index
    %c0_3 = arith.constant 0 : index
    %5 = vector.load %arg2[%c0_2, %c0_3] : memref<16x1xi32, #tpu.memory_space<vmem>>, vector<16x1xi32>
    %6 = vector.shape_cast %5 : vector<16x1xi32> to vector<2x8x1xi32>
    %c1_i32 = arith.constant 1 : i32
    %7 = arith.muli %arg0, %c1_i32 : i32
    %8 = arith.addi %7, %arg1 : i32
    %c16_i32 = arith.constant 16 : i32
    %9 = arith.muli %8, %c16_i32 : i32
    %10 = tpu.iota {dimensions = array<i32: 0>} : vector<2x8x1xi32>
    %11 = tpu.iota {dimensions = array<i32: 1>} : vector<2x8x1xi32>
    %c8_i32 = arith.constant 8 : i32
    %12 = vector.broadcast %c8_i32 : i32 to vector<2x8x1xi32>
    %13 = arith.muli %10, %12 : vector<2x8x1xi32>
    %14 = vector.broadcast %9 : i32 to vector<2x8x1xi32>
    %15 = arith.addi %14, %13 : vector<2x8x1xi32>
    %16 = arith.addi %15, %11 : vector<2x8x1xi32>
    %c0_i32_4 = arith.constant 0 : i32
    %17 = vector.broadcast %c0_i32_4 : i32 to vector<2x8x1xi32>
    %18 = arith.cmpi ne, %6, %17 : vector<2x8x1xi32>
    %c16_i32_5 = arith.constant 16 : i32
    %19 = vector.broadcast %c16_i32_5 : i32 to vector<2x8x1xi32>
    %20 = arith.cmpi slt, %16, %19 : vector<2x8x1xi32>
    %21 = arith.andi %18, %20 : vector<2x8x1xi1>
    %22 = tpu.iota {dimensions = array<i32: 1>} : vector<8x32xi32>
    %23 = vector.shape_cast %22 : vector<8x32xi32> to vector<1x8x32xi32>
    %24 = vector.broadcast %23 : vector<1x8x32xi32> to vector<2x8x32xi32>
    %25 = vector.broadcast %6 : vector<2x8x1xi32> to vector<2x8x32xi32>
    %26 = arith.cmpi eq, %24, %25 : vector<2x8x32xi32>
    %cst = arith.constant -0.899999976 : f32
    %cst_6 = arith.constant -0.0032258064 : f32
    %27 = vector.broadcast %cst : f32 to vector<2x8x32xf32>
    %28 = vector.broadcast %cst_6 : f32 to vector<2x8x32xf32>
    %29 = arith.select %26, %27, %28 : vector<2x8x32xi1>, vector<2x8x32xf32>
    %30 = arith.mulf %4, %29 : vector<2x8x32xf32>
    %cst_7 = arith.constant 0.000000e+00 : f32
    %31 = vector.shape_cast %21 : vector<2x8x1xi1> to vector<2x8x1xi1>
    %32 = vector.broadcast %31 : vector<2x8x1xi1> to vector<2x8x32xi1>
    %33 = vector.broadcast %cst_7 : f32 to vector<2x8x32xf32>
    %34 = arith.select %32, %30, %33 : vector<2x8x32xi1>, vector<2x8x32xf32>
    %c0_8 = arith.constant 0 : index
    %c0_9 = arith.constant 0 : index
    %35 = vector.load %arg5[%c0_8, %c0_9] : memref<8x32xf32, #tpu.memory_space<vmem>>, vector<8x32xf32>
    %cst_10 = arith.constant dense<0.000000e+00> : vector<8x32xf32>
    %36 = vector.multi_reduction <add>, %34, %cst_10 [0] : vector<2x8x32xf32> to vector<8x32xf32>
    %37 = arith.addf %35, %36 : vector<8x32xf32>
    %c0_11 = arith.constant 0 : index
    %c0_12 = arith.constant 0 : index
    %38 = vector.load %arg5[%c0_11, %c0_12] : memref<8x32xf32, #tpu.memory_space<vmem>>, vector<8x32xf32>
    tpu.vector_store %arg5[%c0_11, %c0_12], %37 {strides = array<i32>} : memref<8x32xf32, #tpu.memory_space<vmem>>, vector<8x32xf32>,
    %c0_i32_13 = arith.constant 0 : i32
    %39 = arith.cmpi eq, %arg1, %c0_i32_13 : i32
    %40 = arith.extui %39 : i1 to i32
    %c0_i32_14 = arith.constant 0 : i32
    %41 = arith.cmpi ne, %40, %c0_i32_14 : i32
    scf.if %41 {
      %c0_15 = arith.constant 0 : index
      %c0_16 = arith.constant 0 : index
      %42 = vector.load %arg5[%c0_15, %c0_16] : memref<8x32xf32, #tpu.memory_space<vmem>>, vector<8x32xf32>
      %43 = vector.shape_cast %42 : vector<8x32xf32> to vector<1x8x32xf32>
      %cst_17 = arith.constant dense<0.000000e+00> : vector<1xf32>
      %44 = vector.multi_reduction <add>, %43, %cst_17 [1, 2] : vector<1x8x32xf32> to vector<1xf32>
      %45 = vector.shape_cast %44 : vector<1xf32> to vector<1x1x1xf32>
      %46 = vector.extract %45[0, 0, 0] : f32 from vector<1x1x1xf32>
      %47 = vector.broadcast %46 : f32 to vector<1x8x128xf32>
      %c0_18 = arith.constant 0 : index
      %c0_19 = arith.constant 0 : index
      %c0_20 = arith.constant 0 : index
      %48 = vector.load %arg4[%c0_18, %c0_19, %c0_20] : memref<1x8x128xf32, #tpu.memory_space<vmem>>, vector<1x8x128xf32>
      tpu.vector_store %arg4[%c0_18, %c0_19, %c0_20], %47 {strides = array<i32>} : memref<1x8x128xf32, #tpu.memory_space<vmem>>, vector<1x8x128xf32>,
    } else {
    }
    return
  }
  func.func @transform_0(%arg0: i32, %arg1: i32) -> (i32, i32) {
    %c1_i32 = arith.constant 1 : i32
    %0 = arith.muli %arg0, %c1_i32 : i32
    %1 = arith.addi %0, %arg1 : i32
    %c0_i32 = arith.constant 0 : i32
    %2 = arith.minsi %1, %c0_i32 : i32
    %c0_i32_0 = arith.constant 0 : i32
    %c0_i32_1 = arith.constant 0 : i32
    return %2, %c0_i32_0 : i32, i32
  }
  func.func @transform_1(%arg0: i32, %arg1: i32) -> (i32, i32) {
    %c1_i32 = arith.constant 1 : i32
    %0 = arith.muli %arg0, %c1_i32 : i32
    %1 = arith.addi %0, %arg1 : i32
    %c0_i32 = arith.constant 0 : i32
    %2 = arith.minsi %1, %c0_i32 : i32
    %c0_i32_0 = arith.constant 0 : i32
    %c0_i32_1 = arith.constant 0 : i32
    return %2, %c0_i32_0 : i32, i32
  }
  func.func @transform_2(%arg0: i32, %arg1: i32) -> (i32, i32, i32) {
    %c0_i32 = arith.constant 0 : i32
    %c0_i32_0 = arith.constant 0 : i32
    %c0_i32_1 = arith.constant 0 : i32
    return %arg0, %c0_i32, %c0_i32_0 : i32, i32, i32
  }
}

</mosaic_0001>

<bundles_post_ra>
// kernel: tpu_custom_call.1
= control target key start
LH: loop header
LB: loop body
LE: loop exit
PB: predicated region body
PF: predicated region fallthrough
CT: control target
= control target key end

     0   :  { %v207_v2 = vmov 0   ;;  %s255_s0 = inlined_call_operand.vmem [shape: s32[16,1], index: 0, kind: input, shape index: {}]   ;;  %s256_s1 = inlined_call_operand.vmem [shape: f32[16,32], index: 1, kind: input, shape index: {}]   ;;  %s257_s2 = inlined_call_operand.hbm [shape: f32[1,8,128], index: 2, kind: output, shape index: {}]  }
   0x1   :  { %v84_v0 = vld [vmem:[%s255_s0] sm:$0xff]  ;;  %v85_v1 = vld [vmem:[%s255_s0 + $0x8] sm:$0xff]  ;;  %181 = vset.pattern.permute.xlu0 %v207_v2  ;;  %182 = vset.pattern.permute.xlu1 %v207_v2 }
   0x2   :  { %vm94_vm0 = vcmp.ne.s32.totalorder %v84_v0, 0  ;;  %vm95_vm1 = vcmp.ne.s32.totalorder %v85_v1, 0 }
   0x3   :  { %7 = vsyncpa [#allocation4], 0  ;;  %103 = vperm.xlu0 %181, %v84_v0   ;;  %v114_v3 = vsel %vm94_vm0, 1, %v207_v2  ;;  %v115_v4 = vsel %vm95_vm1, 1, %v207_v2  ;;  %vm80_vm2 = vcmask 261120   ;;  %v208_v5 = vmov 0.0  }
   0x4   :  { %117 = vperm.xlu1 %182, %v114_v3   ;;  %81 = vst.msk [vmem:[#allocation2] sm:$0xff] %vm80_vm2, %v208_v5  ;;  %v100_v6 = vlaneseq  ;;  %v82_v9 = vld [vmem:[%s256_s1] sm:$0xff]  ;;  %v209_v11 = vmov -0.0032258064   ;;  %v83_v15 = vld [vmem:[%s256_s1 + $0x8] sm:$0xff]  ;;  %s210_s1 = smov [#allocation3]  }
   0x5   :  { %s155_s16 = sshll.u32 %s210_s1, 4  ;;  %s156_s16 = int_to_ptr.vmem [resolvable:$true] %s155_s16 }
   0x6   :  { %v101_v7 = vand.u32 127, %v100_v6  ;;  %s183_s18 = scalar_lea.vmem %s156_s16, 128  ;;  %p188_p1 = scmp.lt.s32.totalorder %s156_s16, %s156_s16 }
   0x7   :  { %106 = vperm.xlu0 %181, %v85_v1   ;;  %p184_p0 = scmp.ne.s32.totalorder %s156_s16, %s183_s18  ;;  %p189_p2 = scmp.lt.s32.totalorder %s183_s18, %s183_s18 }
   0x8   :  { %120 = vperm.xlu1 %182, %v115_v4  }
   0x9   :  { %p190_p3 = por %p189_p2, %p188_p1 }
   0xb   :  { %v126_v22 = vld [vmem:[#allocation2] sm:$0xff]  ;;  %p191_p4 = pnand %p190_p3, %p184_p0 }
  0x82   :  { %v104_v8 = vpop.permute.xlu0 %103 }
  0x83   :  { %vm108_vm3 = vcmp.eq.s32.totalorder %v101_v7, %v104_v8  ;;  %v118_v10 = vpop.permute.xlu1 %117 }
  0x84   :  { %v110_v12 = vsel %vm108_vm3, -0.9, %v209_v11  ;;  %vm122_vm4 = vcmp.eq.s32.totalorder %v118_v10, 1 }
  0x85   :  { %v112_v13 = vmul.f32 %v110_v12, %v82_v9 }
  0x86   :  { %v107_v14 = vpop.permute.xlu0 %106 }
  0x87   :  { %vm109_vm5 = vcmp.eq.s32.totalorder %v101_v7, %v107_v14  ;;  %v121_v16 = vpop.permute.xlu1 %120  ;;  %v124_v18 = vsel %vm122_vm4, %v112_v13, 0.0 }
  0x88   :  { %v111_v17 = vsel %vm109_vm5, -0.9, %v209_v11  ;;  %vm123_vm6 = vcmp.eq.s32.totalorder %v121_v16, 1  ;;  %v128_v21 = vsel %vm80_vm2, %v124_v18, 0.0 }
  0x89   :  { %v113_v19 = vmul.f32 %v111_v17, %v83_v15 }
  0x8b   :  { %v125_v20 = vsel %vm123_vm6, %v113_v19, 0.0 }
  0x8c   :  { %v129_v23 = vsel %vm80_vm2, %v125_v20, 0.0 }
  0x8d   :  { %v130_v24 = vadd.f32 %v129_v23, %v128_v21 }
  0x8f   :  { %v131_v25 = vadd.f32 %v130_v24, %v126_v22 }
  0x91   :  { %132 = vst.msk [vmem:[#allocation2] sm:$0xff] %vm80_vm2, %v131_v25 }
  0x98   :  { %v136_v26 = vld [vmem:[#allocation2] sm:$0xff] }
  0x99   :  { %v137_v27 = vsel %vm80_vm2, %v136_v26, 0.0 }
  0x9a   :  { %138 = vadd.xlane.f32.xlu0 %v137_v27 }
 0x127   :  { %v139_v28 = vpop.xlane.xlu0 %138 }
 0x128   :  { %v140_v29 = vrot.slane %v139_v28, 4 }
 0x12a   :  { %v141_v30 = vadd.f32 %v140_v29, %v139_v28 }
 0x12c   :  { %v142_v31 = vrot.slane %v141_v30, 2 }
 0x12e   :  { %v143_v32 = vadd.f32 %v142_v31, %v141_v30 }
 0x130   :  { %v144_v33 = vrot.slane %v143_v32, 1 }
 0x132   :  { %v145_v34 = vadd.f32 %v144_v33, %v143_v32 }
 0x134   :  { %175 = vpush %v145_v34 }
 0x165   :  { %s176_s17 = spop %175 }
 0x166   :  { %v147_v35 = vstv %s176_s17 }
 0x167   :  { %148 = vst [vmem:[#allocation3] sm:$0xff] %v147_v35 }
 0x168   :  { %194 = shalt.err (!%p191_p4)
}
 0x169   :  { %s195_s21 = scalar_lea.hbm %s257_s2, 128 }
 0x16a   :  { %p196_p5 = scmp.ne.s32.totalorder %s257_s2, %s195_s21  ;;  %p199_p6 = scmp.lt.u32.totalorder %s195_s21, %s257_s2 }
 0x16c   :  { %p201_p7 = pnand %p199_p6, %p196_p5 }
 0x16e   :  { %204 = shalt.err (!%p201_p7)
}
 0x16f   :  { %158 = dma.vmem_to_hbm [thread:$0]  %s156_s16, 128, %s257_s2, [#allocation4]  }
 0x170   :  { %205 = dma.done.wait [#allocation4], 128  }
 0x171   :  { %206 = vsyncadd [#allocation4], 4294967168 }
 0x172   :  { %162 = vsyncpa [#allocation4], 1 }

</bundles_post_ra>
